<compile_context>
chip_gen: v5e
topology: v5e:2x2
jax: 0.10.0
libtpu: 0.0.40
codegen_flags: <defaults>
</compile_context>

<pallas_src>
import math
import functools

import jax
import jax.numpy as jnp
from jax import lax
from jax.experimental import pallas as pl
from jax.experimental.pallas import tpu as pltpu


# Scoped-VMEM budget: above v5e's 16 MiB / v6e-v7x's 32 MiB defaults, with
# headroom under v7x's 64 MiB physical VMEM (review item).
_VMEM_LIMIT_BYTES = 48 * 1024 * 1024


def _fit_tile(dim: int, preferred: int) -> int:
    """Largest tile <= preferred that divides dim, preferring (256|128|8)-aligned
    sizes.  Never falls back to the full dimension when dim > preferred (that
    would kill pipelining / risk VMEM OOM at real shapes, fatal first on v7x)."""
    if dim <= preferred:
        return dim
    for granule in (256, 128, 8, 1):
        t = (preferred // granule) * granule
        while t >= granule:
            if dim % t == 0:
                return t
            t -= granule
    return dim  # unreachable: granule=1 always finds a divisor


@functools.lru_cache(maxsize=1)
def _supports_bf16_eup() -> bool:
    """bf16 exp on the EUP exists on v6e/v7x; v5e (and older) would just insert
    converts, so keep f32 softmax math there (review item)."""
    try:
        kind = jax.devices()[0].device_kind.lower()
    except Exception:
        return False
    return ("v6" in kind) or ("v7" in kind)


# ----------------------- tiled projection matmul (MXU) -----------------------

def _matmul_kernel(x_ref, w_ref, o_ref, acc_ref):
    @pl.when(pl.program_id(2) == 0)
    def _():
        acc_ref[...] = jnp.zeros(acc_ref.shape, acc_ref.dtype)

    acc_ref[...] += jnp.dot(x_ref[...], w_ref[...],
                            preferred_element_type=jnp.float32)

    @pl.when(pl.program_id(2) == pl.num_programs(2) - 1)
    def _():
        o_ref[...] = acc_ref[...].astype(o_ref.dtype)


def linear(x2d: jax.Array, w: jax.Array, *, out_dtype=None,
           tm: int = 512, tn: int = 512, tk: int = 1024) -> jax.Array:
    """x2d: (M, K) @ w: (K, N) -> (M, N), K-tiled with an f32 VMEM accumulator.
    Defaults (512, 512, 1024) amortize the ~0.35 us per-grid-step overhead and
    halve x/w HBM re-fetch vs. 256-sized tiles (review item); buffers stay
    ~6 MiB so they fit every generation with the raised VMEM limit."""
    M, K = x2d.shape
    K2, N = w.shape
    assert K == K2
    out_dtype = out_dtype if out_dtype is not None else x2d.dtype
    tm, tn, tk = _fit_tile(M, tm), _fit_tile(N, tn), _fit_tile(K, tk)
    return pl.pallas_call(
        _matmul_kernel,
        out_shape=jax.ShapeDtypeStruct((M, N), out_dtype),
        grid=(M // tm, N // tn, K // tk),
        in_specs=[
            pl.BlockSpec((tm, tk), lambda i, j, k: (i, k)),
            pl.BlockSpec((tk, tn), lambda i, j, k: (k, j)),
        ],
        out_specs=pl.BlockSpec((tm, tn), lambda i, j, k: (i, j)),
        scratch_shapes=[pltpu.VMEM((tm, tn), jnp.float32)],
        compiler_params=pltpu.CompilerParams(
            dimension_semantics=("parallel", "parallel", "arbitrary"),
            vmem_limit_bytes=_VMEM_LIMIT_BYTES),
    )(x2d, w)


# ---------------------- flash attention (online softmax) ---------------------

def _flash_attn_kernel(q_ref, k_ref, v_ref, o_ref, m_sc, l_sc, acc_sc, *, bf16_exp):
    j = pl.program_id(3)

    @pl.when(j == 0)
    def _():
        m_sc[...] = jnp.full(m_sc.shape, -jnp.inf, m_sc.dtype)
        l_sc[...] = jnp.zeros(l_sc.shape, l_sc.dtype)
        acc_sc[...] = jnp.zeros(acc_sc.shape, acc_sc.dtype)

    # 1/sqrt(head_dim) is pre-folded into the Q projection weight, so q is used
    # as-is (no per-KV-step VPU scale).
    q = q_ref[0, 0]                              # (tq, D)
    k = k_ref[0, 0]                              # (tkv, D)
    v = v_ref[0, 0]                              # (tkv, D)

    # QK^T: contract D of both operands, no explicit K transpose.
    s = lax.dot_general(q, k, (((1,), (1,)), ((), ())),
                        preferred_element_type=jnp.float32)       # (tq, tkv) f32

    m_prev = m_sc[...]
    m_new = jnp.maximum(m_prev, jnp.max(s, axis=-1, keepdims=True))
    alpha = jnp.exp(m_prev - m_new)                                # (tq, 1) f32
    if bf16_exp:
        # v6e/v7x: bf16 EUP doubles exp throughput; denominator still sums in f32.
        p = jnp.exp((s - m_new).astype(jnp.bfloat16))              # (tq, tkv) bf16
        p_sum = jnp.sum(p.astype(jnp.float32), axis=-1, keepdims=True)
        pv = p
    else:
        # v5e path: no bf16 VPU/EUP — keep the softmax math in f32.
        p = jnp.exp(s - m_new)
        p_sum = jnp.sum(p, axis=-1, keepdims=True)
        pv = p.astype(v.dtype)
    l_sc[...] = alpha * l_sc[...] + p_sum
    acc_sc[...] = alpha * acc_sc[...] + lax.dot_general(
        pv, v, (((1,), (0,)), ((), ())), preferred_element_type=jnp.float32)
    m_sc[...] = m_new

    @pl.when(j == pl.num_programs(3) - 1)
    def _():
        inv_l = pl.reciprocal(l_sc[...], approx=True)
        o_ref[0, 0] = (acc_sc[...] * inv_l).astype(o_ref.dtype)


def flash_attention(q: jax.Array, k: jax.Array, v: jax.Array, n_rep: int,
                    *, tq: int = 512, tkv: int = 1024) -> jax.Array:
    """q: (B, HQ, S, D); k, v: (B, HKV, SK, D) with HQ == HKV * n_rep.
    tq=512 / tkv=1024 push the K/V-streaming arithmetic intensity above the
    v6e ridge and quarter the grid-step count vs. 256/512 (review item)."""
    B, HQ, S, D = q.shape
    _, HKV, SK, _ = k.shape
    assert HQ == HKV * n_rep
    RQ = n_rep * S
    # Pure reshape (no data movement): query head h = g*n_rep + r groups under
    # KV head g == h // n_rep -> identical to repeat_interleave on K/V, and each
    # KV block is DMA'd once for all n_rep query heads.
    qg = q.reshape(B, HKV, RQ, D)
    tq = _fit_tile(RQ, tq)
    tkv = _fit_tile(SK, tkv)
    kernel = functools.partial(_flash_attn_kernel, bf16_exp=_supports_bf16_eup())
    out = pl.pallas_call(
        kernel,
        out_shape=jax.ShapeDtypeStruct((B, HKV, RQ, D), q.dtype),
        grid=(B, HKV, RQ // tq, SK // tkv),
        in_specs=[
            pl.BlockSpec((1, 1, tq, D), lambda b, g, i, j: (b, g, i, 0)),
            pl.BlockSpec((1, 1, tkv, D), lambda b, g, i, j: (b, g, j, 0)),
            pl.BlockSpec((1, 1, tkv, D), lambda b, g, i, j: (b, g, j, 0)),
        ],
        out_specs=pl.BlockSpec((1, 1, tq, D), lambda b, g, i, j: (b, g, i, 0)),
        scratch_shapes=[
            pltpu.VMEM((tq, 1), jnp.float32),    # running max
            pltpu.VMEM((tq, 1), jnp.float32),    # running denom
            pltpu.VMEM((tq, D), jnp.float32),    # output accumulator
        ],
        # B / HKV / q-tile are all "parallel" (>=2-extent axes available for
        # v7x megacore even at B=1); the KV axis is the resident reduction.
        compiler_params=pltpu.CompilerParams(
            dimension_semantics=("parallel", "parallel", "parallel", "arbitrary"),
            vmem_limit_bytes=_VMEM_LIMIT_BYTES),
    )(qg, k, v)
    return out.reshape(B, HQ, S, D)


# --------------------------------- JAX glue ----------------------------------

def apply_rotary_embeddings(x: jax.Array, cos: jax.Array, sin: jax.Array) -> jax.Array:
    """x: (B, L, H, D). cos/sin: (L, D//2). Interleaved-pair rotation in f32,
    matching torch.view_as_complex on a (..., D//2, 2) reshape."""
    b, l, h, d = x.shape
    xp = x.astype(jnp.float32).reshape(b, l, h, d // 2, 2)
    xr, xi = xp[..., 0], xp[..., 1]
    c = cos[None, :, None, :]
    s = sin[None, :, None, :]
    out = jnp.stack([xr * c - xi * s, xr * s + xi * c], axis=-1)
    return out.reshape(b, l, h, d).astype(x.dtype)


def precompute_freqs(head_dim: int, seq_len: int, start_pos: int = 0,
                     theta: float = 10000.0):
    inv_freq = 1.0 / (theta ** (jnp.arange(0, head_dim, 2, dtype=jnp.float32) / head_dim))
    t = jnp.arange(start_pos, start_pos + seq_len, dtype=jnp.float32)
    angles = jnp.outer(t, inv_freq)                       # (L, D//2)
    return jnp.cos(angles), jnp.sin(angles)


def prepare_weights(wq, wk, wv, wo, head_dim: int):
    """One-time weight prep (call at weight-load time, OUTSIDE the per-token
    forward): fuse Q/K/V into a single bf16 matrix and fold 1/sqrt(head_dim)
    into the Q columns (scalar scale commutes with the RoPE rotation)."""
    scale = 1.0 / math.sqrt(head_dim)
    wqkv = jnp.concatenate([wq * scale, wk, wv], axis=1).astype(jnp.bfloat16)
    return wqkv, wo.astype(jnp.bfloat16)


def self_attention_forward(x, wqkv_bf16, wo_bf16, cos, sin,
                           n_heads_q: int, n_kv_heads: int, head_dim: int):
    """x: (B, S, dim). wqkv_bf16 / wo_bf16 come from prepare_weights()."""
    b, s, dim = x.shape
    n_rep = n_heads_q // n_kv_heads
    in_dtype = x.dtype

    x2d = x.astype(jnp.bfloat16).reshape(b * s, dim)

    # One fused pass over x for Q, K and V (bf16 MXU inputs, f32 accumulation).
    qkv = linear(x2d, wqkv_bf16)
    dq = n_heads_q * head_dim
    dkv = n_kv_heads * head_dim

    # RoPE over Q and K in a single pass (identical per head), V untouched.
    qk = qkv[:, :dq + dkv].reshape(b, s, n_heads_q + n_kv_heads, head_dim)
    qk = apply_rotary_embeddings(qk, cos, sin)
    v = qkv[:, dq + dkv:].reshape(b, s, n_kv_heads, head_dim)

    # TODO(synk): these layout transposes (and the one after attention) could be
    # folded into head-major projection out_specs / the wo in_spec per the perf
    # review; kept in XLA here for lowering robustness.
    q = jnp.transpose(qk[:, :, :n_heads_q], (0, 2, 1, 3))   # (B, HQ, S, D)
    k = jnp.transpose(qk[:, :, n_heads_q:], (0, 2, 1, 3))   # (B, HKV, SK, D)
    v = jnp.transpose(v, (0, 2, 1, 3))                       # (B, HKV, SK, D)

    out = flash_attention(q, k, v, n_rep)                    # (B, HQ, S, D)
    out2d = jnp.transpose(out, (0, 2, 1, 3)).reshape(b * s, n_heads_q * head_dim)
    res = linear(out2d, wo_bf16, out_dtype=in_dtype)
    return res.reshape(b, s, dim)


# ----------------------------- pure-JAX reference -----------------------------

def reference_forward(x, wq, wk, wv, wo, cos, sin,
                      n_heads_q: int, n_kv_heads: int, head_dim: int):
    b, s, dim = x.shape
    n_rep = n_heads_q // n_kv_heads
    f32 = jnp.float32
    xb = x.astype(jnp.bfloat16).astype(f32)
    wqf, wkf, wvf, wof = (w.astype(jnp.bfloat16).astype(f32) for w in (wq, wk, wv, wo))
    x2d = xb.reshape(b * s, dim)
    q = (x2d @ wqf).reshape(b, s, n_heads_q, head_dim)
    k = (x2d @ wkf).reshape(b, s, n_kv_heads, head_dim)
    v = (x2d @ wvf).reshape(b, s, n_kv_heads, head_dim)
    q = apply_rotary_embeddings(q, cos, sin)
    k = apply_rotary_embeddings(k, cos, sin)
    q = jnp.transpose(q, (0, 2, 1, 3))
    k = jnp.transpose(k, (0, 2, 1, 3))
    v = jnp.transpose(v, (0, 2, 1, 3))
    k = jnp.repeat(k, n_rep, axis=1)          # repeat_interleave
    v = jnp.repeat(v, n_rep, axis=1)
    scores = jnp.einsum('bhqd,bhkd->bhqk', q, k) / math.sqrt(head_dim)
    attn = jax.nn.softmax(scores, axis=-1)
    out = jnp.einsum('bhqk,bhkd->bhqd', attn, v)
    out = jnp.transpose(out, (0, 2, 1, 3)).reshape(b * s, n_heads_q * head_dim)
    return (out @ wof).reshape(b, s, dim)


# ------------------------------------ main ------------------------------------

if __name__ == "__main__":
    # Small ModelArgs-consistent shapes.
    batch, seqlen = 2, 8
    dim, n_heads_q, n_kv_heads = 32, 4, 2
    head_dim = dim // n_heads_q            # 8

    key = jax.random.PRNGKey(0)
    kx, kq, kk, kv, ko = jax.random.split(key, 5)

    x = jax.random.normal(kx, (batch, seqlen, dim), dtype=jnp.float32)

    # nn.Linear-style init: U(-1/sqrt(in), 1/sqrt(in)); stored as (in, out) = weight.T.
    def init_w(k, in_dim, out_dim):
        bound = 1.0 / math.sqrt(in_dim)
        return jax.random.uniform(k, (in_dim, out_dim), jnp.float32, -bound, bound)

    wq = init_w(kq, dim, n_heads_q * head_dim)
    wk = init_w(kk, dim, n_kv_heads * head_dim)
    wv = init_w(kv, dim, n_kv_heads * head_dim)
    wo = init_w(ko, n_heads_q * head_dim, dim)

    cos, sin = precompute_freqs(head_dim, seqlen, start_pos=0)

    # Weight prep happens ONCE here (outside the jitted forward) — review item 1.
    wqkv_bf16, wo_bf16 = prepare_weights(wq, wk, wv, wo, head_dim)
    jax.block_until_ready((wqkv_bf16, wo_bf16))

    fwd = jax.jit(functools.partial(
        self_attention_forward,
        n_heads_q=n_heads_q, n_kv_heads=n_kv_heads, head_dim=head_dim))
    out = fwd(x, wqkv_bf16, wo_bf16, cos, sin)
    jax.block_until_ready(out)

    ref = reference_forward(x, wq, wk, wv, wo, cos, sin,
                            n_heads_q=n_heads_q, n_kv_heads=n_kv_heads,
                            head_dim=head_dim)

    assert out.shape == (batch, seqlen, dim)
    assert bool(jnp.all(jnp.isfinite(out)))
    assert bool(jnp.allclose(out, ref, atol=5e-2, rtol=5e-2)), (
        float(jnp.max(jnp.abs(out - ref))))
    print("KERNEL_OK")
</pallas_src>

<mosaic_0001>
module attributes {stable_mosaic.version = 11 : i64} {
  func.func @_matmul_kernel(%arg0: i32, %arg1: i32, %arg2: i32, %arg3: memref<16x32xbf16, #tpu.memory_space<vmem>>, %arg4: memref<32x64xbf16, #tpu.memory_space<vmem>>, %arg5: memref<16x64xbf16, #tpu.memory_space<vmem>>, %arg6: memref<16x64xf32, #tpu.memory_space<vmem>>) attributes {dimension_semantics = [#tpu.dimension_semantics<parallel>, #tpu.dimension_semantics<parallel>, #tpu.dimension_semantics<arbitrary>], iteration_bounds = array<i64: 1, 1, 1>, scalar_prefetch = 0 : i64, scratch_operands = 1 : i64, tpu.core_type = #tpu.core_type<tc>, window_params = [{transform_indices = @transform_0, window_bounds = array<i64: 16, 32>}, {transform_indices = @transform_1, window_bounds = array<i64: 32, 64>}, {transform_indices = @transform_2, window_bounds = array<i64: 16, 64>}]} {
    %c0_i32 = arith.constant 0 : i32
    %0 = arith.cmpi eq, %arg2, %c0_i32 : i32
    %1 = arith.extui %0 : i1 to i32
    %c0_i32_0 = arith.constant 0 : i32
    %2 = arith.cmpi ne, %1, %c0_i32_0 : i32
    scf.if %2 {
      %cst_10 = arith.constant 0.000000e+00 : f32
      %12 = vector.broadcast %cst_10 : f32 to vector<16x64xf32>
      %c0_11 = arith.constant 0 : index
      %c0_12 = arith.constant 0 : index
      %13 = vector.load %arg6[%c0_11, %c0_12] : memref<16x64xf32, #tpu.memory_space<vmem>>, vector<16x64xf32>
      tpu.vector_store %arg6[%c0_11, %c0_12], %12 {strides = array<i32>} : memref<16x64xf32, #tpu.memory_space<vmem>>, vector<16x64xf32>,
    } else {
    }
    %c0 = arith.constant 0 : index
    %c0_1 = arith.constant 0 : index
    %3 = vector.load %arg6[%c0, %c0_1] : memref<16x64xf32, #tpu.memory_space<vmem>>, vector<16x64xf32>
    %c0_2 = arith.constant 0 : index
    %c0_3 = arith.constant 0 : index
    %4 = vector.load %arg3[%c0_2, %c0_3] : memref<16x32xbf16, #tpu.memory_space<vmem>>, vector<16x32xbf16>
    %c0_4 = arith.constant 0 : index
    %c0_5 = arith.constant 0 : index
    %5 = vector.load %arg4[%c0_4, %c0_5] : memref<32x64xbf16, #tpu.memory_space<vmem>>, vector<32x64xbf16>
    %cst = arith.constant dense<0.000000e+00> : vector<16x64xf32>
    %6 = tpu.matmul %4, %5, %cst {dimension_numbers = #tpu.dot_dimension_numbers<[1], [0], [0], [1], [0, 0, 1, 1], [], []>} : vector<16x32xbf16>, vector<32x64xbf16>, vector<16x64xf32> -> vector<16x64xf32>
    %7 = arith.addf %3, %6 : vector<16x64xf32>
    %c0_6 = arith.constant 0 : index
    %c0_7 = arith.constant 0 : index
    %8 = vector.load %arg6[%c0_6, %c0_7] : memref<16x64xf32, #tpu.memory_space<vmem>>, vector<16x64xf32>
    tpu.vector_store %arg6[%c0_6, %c0_7], %7 {strides = array<i32>} : memref<16x64xf32, #tpu.memory_space<vmem>>, vector<16x64xf32>,
    %c0_i32_8 = arith.constant 0 : i32
    %9 = arith.cmpi eq, %arg2, %c0_i32_8 : i32
    %10 = arith.extui %9 : i1 to i32
    %c0_i32_9 = arith.constant 0 : i32
    %11 = arith.cmpi ne, %10, %c0_i32_9 : i32
    scf.if %11 {
      %c0_10 = arith.constant 0 : index
      %c0_11 = arith.constant 0 : index
      %12 = vector.load %arg6[%c0_10, %c0_11] : memref<16x64xf32, #tpu.memory_space<vmem>>, vector<16x64xf32>
      %13 = arith.truncf %12 : vector<16x64xf32> to vector<16x64xbf16>
      %c0_12 = arith.constant 0 : index
      %c0_13 = arith.constant 0 : index
      %14 = vector.load %arg5[%c0_12, %c0_13] : memref<16x64xbf16, #tpu.memory_space<vmem>>, vector<16x64xbf16>
      tpu.vector_store %arg5[%c0_12, %c0_13], %13 {strides = array<i32>} : memref<16x64xbf16, #tpu.memory_space<vmem>>, vector<16x64xbf16>,
    } else {
    }
    return
  }
  func.func @transform_0(%arg0: i32, %arg1: i32, %arg2: i32) -> (i32, i32) {
    %c0_i32 = arith.constant 0 : i32
    return %arg0, %arg2 : i32, i32
  }
  func.func @transform_1(%arg0: i32, %arg1: i32, %arg2: i32) -> (i32, i32) {
    %c0_i32 = arith.constant 0 : i32
    return %arg2, %arg1 : i32, i32
  }
  func.func @transform_2(%arg0: i32, %arg1: i32, %arg2: i32) -> (i32, i32) {
    %c0_i32 = arith.constant 0 : i32
    return %arg0, %arg1 : i32, i32
  }
}

module attributes {stable_mosaic.version = 11 : i64} {
  func.func @_matmul_kernel(%arg0: i32, %arg1: i32, %arg2: i32, %arg3: memref<16x32xbf16, #tpu.memory_space<vmem>>, %arg4: memref<32x32xbf16, #tpu.memory_space<vmem>>, %arg5: memref<16x32xf32, #tpu.memory_space<vmem>>, %arg6: memref<16x32xf32, #tpu.memory_space<vmem>>) attributes {dimension_semantics = [#tpu.dimension_semantics<parallel>, #tpu.dimension_semantics<parallel>, #tpu.dimension_semantics<arbitrary>], iteration_bounds = array<i64: 1, 1, 1>, scalar_prefetch = 0 : i64, scratch_operands = 1 : i64, tpu.core_type = #tpu.core_type<tc>, window_params = [{transform_indices = @transform_0, window_bounds = array<i64: 16, 32>}, {transform_indices = @transform_1, window_bounds = array<i64: 32, 32>}, {transform_indices = @transform_2, window_bounds = array<i64: 16, 32>}]} {
    %c0_i32 = arith.constant 0 : i32
    %0 = arith.cmpi eq, %arg2, %c0_i32 : i32
    %1 = arith.extui %0 : i1 to i32
    %c0_i32_0 = arith.constant 0 : i32
    %2 = arith.cmpi ne, %1, %c0_i32_0 : i32
    scf.if %2 {
      %cst_10 = arith.constant 0.000000e+00 : f32
      %12 = vector.broadcast %cst_10 : f32 to vector<16x32xf32>
      %c0_11 = arith.constant 0 : index
      %c0_12 = arith.constant 0 : index
      %13 = vector.load %arg6[%c0_11, %c0_12] : memref<16x32xf32, #tpu.memory_space<vmem>>, vector<16x32xf32>
      tpu.vector_store %arg6[%c0_11, %c0_12], %12 {strides = array<i32>} : memref<16x32xf32, #tpu.memory_space<vmem>>, vector<16x32xf32>,
    } else {
    }
    %c0 = arith.constant 0 : index
    %c0_1 = arith.constant 0 : index
    %3 = vector.load %arg6[%c0, %c0_1] : memref<16x32xf32, #tpu.memory_space<vmem>>, vector<16x32xf32>
    %c0_2 = arith.constant 0 : index
    %c0_3 = arith.constant 0 : index
    %4 = vector.load %arg3[%c0_2, %c0_3] : memref<16x32xbf16, #tpu.memory_space<vmem>>, vector<16x32xbf16>
    %c0_4 = arith.constant 0 : index
    %c0_5 = arith.constant 0 : index
    %5 = vector.load %arg4[%c0_4, %c0_5] : memref<32x32xbf16, #tpu.memory_space<vmem>>, vector<32x32xbf16>
    %cst = arith.constant dense<0.000000e+00> : vector<16x32xf32>
    %6 = tpu.matmul %4, %5, %cst {dimension_numbers = #tpu.dot_dimension_numbers<[1], [0], [0], [1], [0, 0, 1, 1], [], []>} : vector<16x32xbf16>, vector<32x32xbf16>, vector<16x32xf32> -> vector<16x32xf32>
    %7 = arith.addf %3, %6 : vector<16x32xf32>
    %c0_6 = arith.constant 0 : index
    %c0_7 = arith.constant 0 : index
    %8 = vector.load %arg6[%c0_6, %c0_7] : memref<16x32xf32, #tpu.memory_space<vmem>>, vector<16x32xf32>
    tpu.vector_store %arg6[%c0_6, %c0_7], %7 {strides = array<i32>} : memref<16x32xf32, #tpu.memory_space<vmem>>, vector<16x32xf32>,
    %c0_i32_8 = arith.constant 0 : i32
    %9 = arith.cmpi eq, %arg2, %c0_i32_8 : i32
    %10 = arith.extui %9 : i1 to i32
    %c0_i32_9 = arith.constant 0 : i32
    %11 = arith.cmpi ne, %10, %c0_i32_9 : i32
    scf.if %11 {
      %c0_10 = arith.constant 0 : index
      %c0_11 = arith.constant 0 : index
      %12 = vector.load %arg6[%c0_10, %c0_11] : memref<16x32xf32, #tpu.memory_space<vmem>>, vector<16x32xf32>
      %c0_12 = arith.constant 0 : index
      %c0_13 = arith.constant 0 : index
      %13 = vector.load %arg5[%c0_12, %c0_13] : memref<16x32xf32, #tpu.memory_space<vmem>>, vector<16x32xf32>
      tpu.vector_store %arg5[%c0_12, %c0_13], %12 {strides = array<i32>} : memref<16x32xf32, #tpu.memory_space<vmem>>, vector<16x32xf32>,
    } else {
    }
    return
  }
  func.func @transform_0(%arg0: i32, %arg1: i32, %arg2: i32) -> (i32, i32) {
    %c0_i32 = arith.constant 0 : i32
    return %arg0, %arg2 : i32, i32
  }
  func.func @transform_1(%arg0: i32, %arg1: i32, %arg2: i32) -> (i32, i32) {
    %c0_i32 = arith.constant 0 : i32
    return %arg2, %arg1 : i32, i32
  }
  func.func @transform_2(%arg0: i32, %arg1: i32, %arg2: i32) -> (i32, i32) {
    %c0_i32 = arith.constant 0 : i32
    return %arg0, %arg1 : i32, i32
  }
}

module attributes {stable_mosaic.version = 11 : i64} {
  func.func @_flash_attn_kernel(%arg0: i32, %arg1: i32, %arg2: i32, %arg3: i32, %arg4: memref<1x1x16x8xbf16, #tpu.memory_space<vmem>>, %arg5: memref<1x1x8x8xbf16, #tpu.memory_space<vmem>>, %arg6: memref<1x1x8x8xbf16, #tpu.memory_space<vmem>>, %arg7: memref<1x1x16x8xbf16, #tpu.memory_space<vmem>>, %arg8: memref<16x1xf32, #tpu.memory_space<vmem>>, %arg9: memref<16x1xf32, #tpu.memory_space<vmem>>, %arg10: memref<16x8xf32, #tpu.memory_space<vmem>>) attributes {dimension_semantics = [#tpu.dimension_semantics<parallel>, #tpu.dimension_semantics<parallel>, #tpu.dimension_semantics<parallel>, #tpu.dimension_semantics<arbitrary>], iteration_bounds = array<i64: 2, 2, 1, 1>, scalar_prefetch = 0 : i64, scratch_operands = 3 : i64, tpu.core_type = #tpu.core_type<tc>, window_params = [{transform_indices = @transform_0, window_bounds = array<i64: 1, 1, 16, 8>}, {transform_indices = @transform_1, window_bounds = array<i64: 1, 1, 8, 8>}, {transform_indices = @transform_2, window_bounds = array<i64: 1, 1, 8, 8>}, {transform_indices = @transform_3, window_bounds = array<i64: 1, 1, 16, 8>}]} {
    %c0_i32 = arith.constant 0 : i32
    %0 = arith.cmpi eq, %arg3, %c0_i32 : i32
    %1 = arith.extui %0 : i1 to i32
    %c0_i32_0 = arith.constant 0 : i32
    %2 = arith.cmpi ne, %1, %c0_i32_0 : i32
    scf.if %2 {
      %cst_29 = arith.constant 0xFF800000 : f32
      %36 = vector.broadcast %cst_29 : f32 to vector<16x1xf32>
      %c0_30 = arith.constant 0 : index
      %c0_31 = arith.constant 0 : index
      %37 = vector.load %arg8[%c0_30, %c0_31] : memref<16x1xf32, #tpu.memory_space<vmem>>, vector<16x1xf32>
      tpu.vector_store %arg8[%c0_30, %c0_31], %36 {strides = array<i32>} : memref<16x1xf32, #tpu.memory_space<vmem>>, vector<16x1xf32>,
      %cst_32 = arith.constant 0.000000e+00 : f32
      %38 = vector.broadcast %cst_32 : f32 to vector<16x1xf32>
      %c0_33 = arith.constant 0 : index
      %c0_34 = arith.constant 0 : index
      %39 = vector.load %arg9[%c0_33, %c0_34] : memref<16x1xf32, #tpu.memory_space<vmem>>, vector<16x1xf32>
      tpu.vector_store %arg9[%c0_33, %c0_34], %38 {strides = array<i32>} : memref<16x1xf32, #tpu.memory_space<vmem>>, vector<16x1xf32>,
      %cst_35 = arith.constant 0.000000e+00 : f32
      %40 = vector.broadcast %cst_35 : f32 to vector<16x8xf32>
      %c0_36 = arith.constant 0 : index
      %c0_37 = arith.constant 0 : index
      %41 = vector.load %arg10[%c0_36, %c0_37] : memref<16x8xf32, #tpu.memory_space<vmem>>, vector<16x8xf32>
      tpu.vector_store %arg10[%c0_36, %c0_37], %40 {strides = array<i32>} : memref<16x8xf32, #tpu.memory_space<vmem>>, vector<16x8xf32>,
    } else {
    }
    %c0 = arith.constant 0 : index
    %c0_1 = arith.constant 0 : index
    %c0_2 = arith.constant 0 : index
    %c0_3 = arith.constant 0 : index
    %3 = vector.load %arg4[%c0, %c0_1, %c0_2, %c0_3] : memref<1x1x16x8xbf16, #tpu.memory_space<vmem>>, vector<1x1x16x8xbf16>
    %4 = vector.shape_cast %3 : vector<1x1x16x8xbf16> to vector<16x8xbf16>
    %c0_4 = arith.constant 0 : index
    %c0_5 = arith.constant 0 : index
    %c0_6 = arith.constant 0 : index
    %c0_7 = arith.constant 0 : index
    %5 = vector.load %arg5[%c0_4, %c0_5, %c0_6, %c0_7] : memref<1x1x8x8xbf16, #tpu.memory_space<vmem>>, vector<1x1x8x8xbf16>
    %6 = vector.shape_cast %5 : vector<1x1x8x8xbf16> to vector<8x8xbf16>
    %c0_8 = arith.constant 0 : index
    %c0_9 = arith.constant 0 : index
    %c0_10 = arith.constant 0 : index
    %c0_11 = arith.constant 0 : index
    %7 = vector.load %arg6[%c0_8, %c0_9, %c0_10, %c0_11] : memref<1x1x8x8xbf16, #tpu.memory_space<vmem>>, vector<1x1x8x8xbf16>
    %8 = vector.shape_cast %7 : vector<1x1x8x8xbf16> to vector<8x8xbf16>
    %cst = arith.constant dense<0.000000e+00> : vector<16x8xf32>
    %9 = tpu.matmul %4, %6, %cst {dimension_numbers = #tpu.dot_dimension_numbers<[1], [1], [0], [0], [0, 0, 1, 0], [], []>} : vector<16x8xbf16>, vector<8x8xbf16>, vector<16x8xf32> -> vector<16x8xf32>
    %c0_12 = arith.constant 0 : index
    %c0_13 = arith.constant 0 : index
    %10 = vector.load %arg8[%c0_12, %c0_13] : memref<16x1xf32, #tpu.memory_space<vmem>>, vector<16x1xf32>
    %cst_14 = arith.constant dense<0xFF800000> : vector<16xf32>
    %11 = vector.multi_reduction <maximumf>, %9, %cst_14 [1] : vector<16x8xf32> to vector<16xf32>
    %12 = vector.shape_cast %11 : vector<16xf32> to vector<16x1xf32>
    %13 = arith.maximumf %10, %12 : vector<16x1xf32>
    %14 = arith.subf %10, %13 : vector<16x1xf32>
    %15 = math.exp %14 : vector<16x1xf32>
    %16 = vector.broadcast %13 : vector<16x1xf32> to vector<16x8xf32>
    %17 = arith.subf %9, %16 : vector<16x8xf32>
    %18 = math.exp %17 : vector<16x8xf32>
    %cst_15 = arith.constant dense<0.000000e+00> : vector<16xf32>
    %19 = vector.multi_reduction <add>, %18, %cst_15 [1] : vector<16x8xf32> to vector<16xf32>
    %20 = vector.shape_cast %19 : vector<16xf32> to vector<16x1xf32>
    %21 = arith.truncf %18 : vector<16x8xf32> to vector<16x8xbf16>
    %c0_16 = arith.constant 0 : index
    %c0_17 = arith.constant 0 : index
    %22 = vector.load %arg9[%c0_16, %c0_17] : memref<16x1xf32, #tpu.memory_space<vmem>>, vector<16x1xf32>
    %23 = arith.mulf %15, %22 : vector<16x1xf32>
    %24 = arith.addf %23, %20 : vector<16x1xf32>
    %c0_18 = arith.constant 0 : index
    %c0_19 = arith.constant 0 : index
    %25 = vector.load %arg9[%c0_18, %c0_19] : memref<16x1xf32, #tpu.memory_space<vmem>>, vector<16x1xf32>
    tpu.vector_store %arg9[%c0_18, %c0_19], %24 {strides = array<i32>} : memref<16x1xf32, #tpu.memory_space<vmem>>, vector<16x1xf32>,
    %c0_20 = arith.constant 0 : index
    %c0_21 = arith.constant 0 : index
    %26 = vector.load %arg10[%c0_20, %c0_21] : memref<16x8xf32, #tpu.memory_space<vmem>>, vector<16x8xf32>
    %27 = vector.broadcast %15 : vector<16x1xf32> to vector<16x8xf32>
    %28 = arith.mulf %27, %26 : vector<16x8xf32>
    %cst_22 = arith.constant dense<0.000000e+00> : vector<16x8xf32>
    %29 = tpu.matmul %21, %8, %cst_22 {dimension_numbers = #tpu.dot_dimension_numbers<[1], [0], [0], [1], [0, 0, 1, 1], [], []>} : vector<16x8xbf16>, vector<8x8xbf16>, vector<16x8xf32> -> vector<16x8xf32>
    %30 = arith.addf %28, %29 : vector<16x8xf32>
    %c0_23 = arith.constant 0 : index
    %c0_24 = arith.constant 0 : index
    %31 = vector.load %arg10[%c0_23, %c0_24] : memref<16x8xf32, #tpu.memory_space<vmem>>, vector<16x8xf32>
    tpu.vector_store %arg10[%c0_23, %c0_24], %30 {strides = array<i32>} : memref<16x8xf32, #tpu.memory_space<vmem>>, vector<16x8xf32>,
    %c0_25 = arith.constant 0 : index
    %c0_26 = arith.constant 0 : index
    %32 = vector.load %arg8[%c0_25, %c0_26] : memref<16x1xf32, #tpu.memory_space<vmem>>, vector<16x1xf32>
    tpu.vector_store %arg8[%c0_25, %c0_26], %13 {strides = array<i32>} : memref<16x1xf32, #tpu.memory_space<vmem>>, vector<16x1xf32>,
    %c0_i32_27 = arith.constant 0 : i32
    %33 = arith.cmpi eq, %arg3, %c0_i32_27 : i32
    %34 = arith.extui %33 : i1 to i32
    %c0_i32_28 = arith.constant 0 : i32
    %35 = arith.cmpi ne, %34, %c0_i32_28 : i32
    scf.if %35 {
      %c0_29 = arith.constant 0 : index
      %c0_30 = arith.constant 0 : index
      %36 = vector.load %arg9[%c0_29, %c0_30] : memref<16x1xf32, #tpu.memory_space<vmem>>, vector<16x1xf32>
      %37 = tpu.reciprocal %36 {approx = true} : vector<16x1xf32> -> vector<16x1xf32>
      %c0_31 = arith.constant 0 : index
      %c0_32 = arith.constant 0 : index
      %38 = vector.load %arg10[%c0_31, %c0_32] : memref<16x8xf32, #tpu.memory_space<vmem>>, vector<16x8xf32>
      %39 = vector.broadcast %37 : vector<16x1xf32> to vector<16x8xf32>
      %40 = arith.mulf %38, %39 : vector<16x8xf32>
      %41 = arith.truncf %40 : vector<16x8xf32> to vector<16x8xbf16>
      %c0_33 = arith.constant 0 : index
      %c0_34 = arith.constant 0 : index
      %c0_35 = arith.constant 0 : index
      %c0_36 = arith.constant 0 : index
      %42 = vector.load %arg7[%c0_33, %c0_34, %c0_35, %c0_36] : memref<1x1x16x8xbf16, #tpu.memory_space<vmem>>, vector<1x1x16x8xbf16>
      %43 = vector.shape_cast %42 : vector<1x1x16x8xbf16> to vector<16x8xbf16>
      %44 = vector.shape_cast %41 : vector<16x8xbf16> to vector<1x1x16x8xbf16>
      tpu.vector_store %arg7[%c0_33, %c0_34, %c0_35, %c0_36], %44 {strides = array<i32>} : memref<1x1x16x8xbf16, #tpu.memory_space<vmem>>, vector<1x1x16x8xbf16>,
    } else {
    }
    return
  }
  func.func @transform_0(%arg0: i32, %arg1: i32, %arg2: i32, %arg3: i32) -> (i32, i32, i32, i32) {
    %c0_i32 = arith.constant 0 : i32
    %c0_i32_0 = arith.constant 0 : i32
    return %arg0, %arg1, %arg2, %c0_i32 : i32, i32, i32, i32
  }
  func.func @transform_1(%arg0: i32, %arg1: i32, %arg2: i32, %arg3: i32) -> (i32, i32, i32, i32) {
    %c0_i32 = arith.constant 0 : i32
    %c0_i32_0 = arith.constant 0 : i32
    return %arg0, %arg1, %arg3, %c0_i32 : i32, i32, i32, i32
  }
  func.func @transform_2(%arg0: i32, %arg1: i32, %arg2: i32, %arg3: i32) -> (i32, i32, i32, i32) {
    %c0_i32 = arith.constant 0 : i32
    %c0_i32_0 = arith.constant 0 : i32
    return %arg0, %arg1, %arg3, %c0_i32 : i32, i32, i32, i32
  }
  func.func @transform_3(%arg0: i32, %arg1: i32, %arg2: i32, %arg3: i32) -> (i32, i32, i32, i32) {
    %c0_i32 = arith.constant 0 : i32
    %c0_i32_0 = arith.constant 0 : i32
    return %arg0, %arg1, %arg2, %c0_i32 : i32, i32, i32, i32
  }
}

</mosaic_0001>

<bundles_post_ra>
// kernel: self_attention_forward.3
= control target key start
LH: loop header
LB: loop body
LE: loop exit
PB: predicated region body
PF: predicated region fallthrough
CT: control target
= control target key end

     0   :  { %vm16_vm0 = vcmask 523264   ;;  %v98_v1 = vmov 0.0   ;;  %vm44_vm1 = vcmask 261120   ;;  %vm74_vm2 = vcmask 519168   ;;  %s133_s1 = inlined_call_operand.vmem [shape: bf16[32,64], index: 1, kind: input, shape index: {}]   ;;  %s134_s0 = inlined_call_operand.vmem [shape: bf16[16,32], index: 0, kind: input, shape index: {}]   ;;  %s135_s2 = inlined_call_operand.vmem [shape: bf16[16,64], index: 2, kind: output, shape index: {}]  }
   0x1   :  { %v96_v0 = vld [vmem:[%s133_s1 + $0x8] sm:$0xff]  ;;  %17 = vst.msk [vmem:[#allocation2] sm:$0xff] %vm16_vm0, %v98_v1  ;;  %v95_v2 = vld [vmem:[%s133_s1] sm:$0xff] }
   0x2   :  { %18 = vst.msk [vmem:[#allocation2 + $0x8] sm:$0xff] %vm16_vm0, %v98_v1  ;;  %54 = vmatpush.bf16.msra.mxu0 %v96_v0  ;;  %v94_v3 = vld [vmem:[%s134_s0] sm:$0xff] }
   0x6   :  { %55 = vmatpush.bf16.msra.mxu0 %v95_v2 }
   0x8   :  { %v19_v4 = vld [vmem:[#allocation2] sm:$0xff] }
   0x9   :  { %93 = vmatmul.msk.bf16.vlgmr.msra.gmra.mxu0 %vm44_vm1, %v94_v3  ;;  %v20_v7 = vld [vmem:[#allocation2 + $0x8] sm:$0xff] }
  0x86   :  { %v57_v5 = vpop.f32.mrf.mxu0 }
  0x87   :  { %v62_v6 = vadd.f32 %v57_v5, %v19_v4 }
  0x89   :  { %65 = vst.msk [vmem:[#allocation2] sm:$0xff] %vm16_vm0, %v62_v6 }
  0x8e   :  { %v59_v8 = vpop.f32.mrf.mxu0 }
  0x8f   :  { %v63_v9 = vadd.f32 %v59_v8, %v20_v7 }
  0x90   :  { %v70_v10 = vld [vmem:[#allocation2] sm:$0xff] }
  0x91   :  { %v72_v11 = vpack.c.bf16 %v70_v10, %v70_v10  ;;  %66 = vst.msk [vmem:[#allocation2 + $0x8] sm:$0xff] %vm16_vm0, %v63_v9 }
  0x93   :  { %75 = vst.msk [vmem:[%s135_s2] sm:$0xf] %vm74_vm2, %v72_v11 }
  0x98   :  { %v71_v12 = vld [vmem:[#allocation2 + $0x8] sm:$0xff] }
  0x99   :  { %v73_v13 = vpack.c.bf16 %v71_v12, %v71_v12 }
  0x9b   :  { %76 = vst.msk [vmem:[%s135_s2 + $0x4] sm:$0xf] %vm74_vm2, %v73_v13 }

// kernel: self_attention_forward.5
= control target key start
LH: loop header
LB: loop body
LE: loop exit
PB: predicated region body
PF: predicated region fallthrough
CT: control target
= control target key end

     0   :  { %vm17_vm0 = vcmask 261120   ;;  %v138_v1 = vmov 0.0   ;;  %s176_s0 = inlined_call_operand.vmem [shape: bf16[16,32], index: 0, kind: input, shape index: {}]   ;;  %s177_s1 = inlined_call_operand.vmem [shape: bf16[32,32], index: 1, kind: input, shape index: {}]   ;;  %s178_s2 = inlined_call_operand.hbm [shape: f32[16,32], index: 2, kind: output, shape index: {}]  }
   0x1   :  { %v107_v0 = vld [vmem:[%s177_s1 + $0x8] sm:$0xff]  ;;  %18 = vst.msk [vmem:[#allocation2] sm:$0xff] %vm17_vm0, %v138_v1 }
   0x2   :  { %7 = vsyncpa [#allocation4], 0  ;;  %55 = vmatpush.bf16.msra.mxu0 %v107_v0  ;;  %v106_v2 = vld [vmem:[%s177_s1] sm:$0xff]  ;;  %19 = vst.msk [vmem:[#allocation2 + $0x8] sm:$0xff] %vm17_vm0, %v138_v1  ;;  %s139_s1 = smov [#allocation3]   ;;  %s80_s17 = sshll.u32 %s178_s2, 4  ;;  %s81_s17 = int_to_ptr.hbm [resolvable:$true] %s80_s17 }
   0x3   :  { %v105_v3 = vld [vmem:[%s176_s0] sm:$0xff]  ;;  %s78_s15 = sshll.u32 %s139_s1, 4  ;;  %s140_s18 = smov 128   ;;  %s79_s15 = int_to_ptr.vmem [resolvable:$true] %s78_s15 }
   0x4   :  { %s141_s19 = smov 8  }
   0x6   :  { %56 = vmatpush.bf16.msra.mxu0 %v106_v2 }
   0x8   :  { %v20_v4 = vld [vmem:[#allocation2] sm:$0xff] }
   0x9   :  { %104 = vmatmul.msk.bf16.vlgmr.msra.gmra.mxu0 %vm17_vm0, %v105_v3  ;;  %v21_v7 = vld [vmem:[#allocation2 + $0x8] sm:$0xff] }
  0x86   :  { %v58_v5 = vpop.f32.mrf.mxu0 }
  0x87   :  { %v63_v6 = vadd.f32 %v58_v5, %v20_v4 }
  0x89   :  { %65 = vst.msk [vmem:[#allocation2] sm:$0xff] %vm17_vm0, %v63_v6 }
  0x8e   :  { %v60_v8 = vpop.f32.mrf.mxu0 }
  0x8f   :  { %v64_v9 = vadd.f32 %v60_v8, %v21_v7 }
  0x90   :  { %v70_v10 = vld [vmem:[#allocation2] sm:$0xff] }
  0x91   :  { %66 = vst.msk [vmem:[#allocation2 + $0x8] sm:$0xff] %vm17_vm0, %v64_v9 }
  0x92   :  { %72 = vst.msk [vmem:[#allocation3] sm:$0xff] %vm17_vm0, %v70_v10 }
  0x98   :  { %v71_v11 = vld [vmem:[#allocation2 + $0x8] sm:$0xff] }
  0x99   :  { %73 = vst.msk [vmem:[#allocation3 + $0x8] sm:$0xff] %vm17_vm0, %v71_v11 }
  0x9a   :  { %86 = dma.vmem_to_hbm [thread:$0]  %s79_s15, 256, %s81_s17, [#allocation4], %s140_s18, %s140_s18, %s141_s19  }
  0x9b   :  { %136 = dma.done.wait [#allocation4], 256  }
  0x9c   :  { %137 = vsyncadd [#allocation4], 4294967040 }
  0x9d   :  { %91 = vsyncpa [#allocation4], 1 }

// kernel: self_attention_forward.4
= control target key start
LH: loop header
LB: loop body
LE: loop exit
PB: predicated region body
PF: predicated region fallthrough
CT: control target
= control target key end

     0   :  { %s795_s12 = smov 0   ;;  %s797_s13 = smov 0   ;;  %s885_s0 = inlined_call_operand.vmem [shape: bf16[2,2,16,8], index: 0, kind: input, shape index: {}]   ;;  %s886_s1 = inlined_call_operand.vmem [shape: bf16[2,2,8,8], index: 1, kind: input, shape index: {}]   ;;  %s887_s2 = inlined_call_operand.vmem [shape: bf16[2,2,8,8], index: 2, kind: input, shape index: {}]   ;;  %s888_s3 = inlined_call_operand.vmem [shape: bf16[2,2,16,8], index: 3, kind: output, shape index: {}]  }
   0x1   :  { %s799_s14 = smov 0   ;;  %s801_s15 = smov 0  }
   0x2   :  { %s803_s16 = smov 0  }
   0x3 LB: > { %s35_s17 = sadd.s32 1, %s762_s14  ;;  %s39_s18 = sadd.s32 1, %s766_s15  ;;  %s770_s16 = sphi %s803_s16, %s13_s16   ;;  %s766_s15 = sphi %s801_s15, %s892_s15   ;;  %s762_s14 = sphi %s799_s14, %s891_s14   ;;  %s758_s13 = sphi %s797_s13, %s890_s13   ;;  %s754_s12 = sphi %s795_s12, %s889_s12  }
   0x4   : > { %p37_p0 = scmp.ge.s32.totalorder %s35_s17, 2  ;;  %p654_p1 = scmp.ge.s32.totalorder %s770_s16, 1 }
   0x5   : > { %p220_p2 = scmp.lt.s32.totalorder %s770_s16, 5 }
   0x6   : > { %s894_s17 = smov (%p37_p0, %s35_s17), 0  ;;  %s896_s18 = smov (!%p37_p0, %s39_s18), %s766_s15 }
   0x7   : > { %p221_p3 = pnand %p654_p1, %p220_p2  ;;  %p41_p4 = scmp.ge.s32.totalorder %s896_s18, 2 }
   0x8   : > { %p283_p5 = scmp.lt.s32.totalorder (!%p221_p3), %s758_s13, 1  ;;  %p285_p6 = scmp.lt.s32.totalorder (!%p221_p3), %s754_s12, 1 }
   0x9   : > { %s898_s18 = smov (%p41_p4, %s896_s18), 0  ;;  %224 = sbr.rel (%p221_p3) target bundleno = 661 (0x295), region = 32 }
   0xe   : > { %s900_s13 = smov (!%p283_p5, %s758_s13), 1  ;;  %s902_s12 = smov (!%p285_p6, %s754_s12), 1  ;;  %vm342_vm0 = vcmask 64512   ;;  %vm337_vm1 = vcmask 7168   ;;  %v772_v3 = vmov -inf   ;;  %v773_v8 = vmov 0  }
   0xf   : > { %s656_s19 = sshll.u32 %s900_s13, 2  ;;  %s658_s20 = sshll.u32 %s900_s13, 1  ;;  %338 = vst.msk [vmem:[#allocation2] sm:$0xff] %vm337_vm1, %v772_v3  ;;  %717 = vset.pattern.permute.xlu1 %v773_v8  ;;  %718 = vset.pattern.permute.xlu0 %v773_v8  ;;  %v774_v9 = vmov 0.0   ;;  %vm440_vm2 = vcmask 1043456   ;;  %vm487_vm3 = vcmask 60416  }
  0x10   : > { %s655_s21 = sshll.u32 %s902_s12, 1  ;;  %s825_s22 = sadd.s32 %s658_s20, %s902_s12  ;;  %339 = vst.msk [vmem:[#allocation2 + $0x8] sm:$0xff] %vm337_vm1, %v772_v3  ;;  %719 = vset.pattern.permute.xlu2 %v773_v8 }
  0x11   : > { %s659_s23 = sshll.u32 %s825_s22, 2  ;;  %s828_s24 = sadd.s32 %s656_s19, %s655_s21  ;;  %343 = vst.msk [vmem:[#allocation4] sm:$0xff] %vm342_vm0, %v774_v9 }
  0x12   : > { %s306_s27 = scalar_lea.vmem %s886_s1, %s659_s23  ;;  %s657_s28 = sshll.u32 %s828_s24, 2  ;;  %340 = vst.msk [vmem:[#allocation3] sm:$0xff] %vm337_vm1, %v774_v9 }
  0x13   : > { %v347_v0 = vld [vmem:[%s306_s27] sm:$0xf]  ;;  %s294_s4 = scalar_lea.vmem %s885_s0, %s657_s28  ;;  %341 = vst.msk [vmem:[#allocation3 + $0x8] sm:$0xff] %vm337_vm1, %v774_v9  ;;  %s317_s7 = scalar_lea.vmem %s887_s2, %s659_s23 }
  0x14   : > { %v359_v1 = vsel %vm342_vm0, %v347_v0, 0  ;;  %v673_v2 = vld [vmem:[%s294_s4] sm:$0xff]  ;;  %344 = vst.msk [vmem:[#allocation4 + $0x8] sm:$0xff] %vm342_vm0, %v774_v9  ;;  %s330_s10 = scalar_lea.vmem %s888_s3, %s657_s28 }
  0x15   : > { %368 = vmatpush.bf16.xpose.msra.mxu0 %v359_v1  ;;  %v348_v22 = vld [vmem:[%s317_s7] sm:$0xf] }
  0x16   : > { %v375_v10 = vld [vmem:[#allocation2] sm:$0xff]  ;;  %v442_v23 = vsel %vm440_vm2, %v348_v22, 0 }
  0x17   : > { %v376_v15 = vld [vmem:[#allocation2 + $0x8] sm:$0xff]  ;;  %451 = vmatpush.bf16.msra.mxu1 %v442_v23 }
  0x18   : > { %v423_v44 = vld [vmem:[#allocation4] sm:$0xff] }
  0x19   : > { %v414_v35 = vld [vmem:[#allocation3] sm:$0xff] }
  0x1a   : > { %v415_v39 = vld [vmem:[#allocation3 + $0x8] sm:$0xff] }
  0x1b   : > { %v424_v51 = vld [vmem:[#allocation4 + $0x8] sm:$0xff] }
  0x1c   : > { %669 = vmatmul.msk.bf16.vlgmr.msra.gmra.mxu0 %vm342_vm0, %v673_v2 }
  0x99   : > { %v370_v4 = vpop.f32.mrf.mxu0 }
  0x9a   : > { %v377_v5 = vsel %vm342_vm0, %v370_v4, -inf }
  0x9b   : > { %378 = vmax.xlane.f32.xlu0 %v377_v5 }
  0xa1   : > { %v372_v6 = vpop.f32.mrf.mxu0 }
  0xa2   : > { %v380_v7 = vsel %vm342_vm0, %v372_v6, -inf }
  0xa3   : > { %381 = vmax.xlane.f32.xlu0 %v380_v7 }
 0x10e   : > { %v379_v11 = vpop.xlane.xlu0 %378 }
 0x10f   : > { %v383_v12 = vmax.f32 %v375_v10, %v379_v11 }
 0x111   : > { %v385_v13 = vsub.f32 %v375_v10, %v383_v12  ;;  %462 = vst.msk [vmem:[#allocation2] sm:$0xff] %vm337_vm1, %v383_v12  ;;  %393 = vperm.xlu1 %717, %v383_v12  }
 0x113   : > { %v387_v14 = vmul.f32 1.442695, %v385_v13 }
 0x115   : > { %720 = vpow2.f32 %v387_v14 }
 0x116   : > { %v382_v16 = vpop.xlane.xlu0 %381 }
 0x117   : > { %v384_v17 = vmax.f32 %v376_v15, %v382_v16 }
 0x119   : > { %v386_v18 = vsub.f32 %v376_v15, %v384_v17  ;;  %463 = vst.msk [vmem:[#allocation2 + $0x8] sm:$0xff] %vm337_vm1, %v384_v17  ;;  %398 = vperm.xlu1 %717, %v384_v17  }
 0x11b   : > { %v721_v19 = vpop.eup %720  ;;  %v389_v20 = vmul.f32 1.442695, %v386_v18 }
 0x11c   : > { %427 = vperm.xlu0 %718, %v721_v19   ;;  %v416_v36 = vmul.f32 %v721_v19, %v414_v35 }
 0x11d   : > { %722 = vpow2.f32 %v389_v20 }
 0x123   : > { %v723_v21 = vpop.eup %722 }
 0x124   : > { %432 = vperm.xlu1 %717, %v723_v21   ;;  %v417_v40 = vmul.f32 %v723_v21, %v415_v39 }
 0x183   : > { %v394_v24 = vpop.permute.xlu1 %393 }
 0x184   : > { %v401_v25 = vsub.f32 %v370_v4, %v394_v24 }
 0x186   : > { %v403_v26 = vmul.f32 1.442695, %v401_v25 }
 0x188   : > { %724 = vpow2.f32 %v403_v26 }
 0x18b   : > { %v399_v27 = vpop.permute.xlu1 %398 }
 0x18c   : > { %v402_v28 = vsub.f32 %v372_v6, %v399_v27 }
 0x18e   : > { %v725_v29 = vpop.eup %724  ;;  %v405_v30 = vmul.f32 1.442695, %v402_v28  ;;  %v428_v45 = vpop.permute.xlu0 %427 }
 0x18f   : > { %v407_v31 = vsel %vm342_vm0, %v725_v29, 0.0  ;;  %v435_v47 = vmul.f32 %v428_v45, %v423_v44 }
 0x190   : > { %726 = vpow2.f32 %v405_v30  ;;  %408 = vadd.xlane.f32.xlu2 %v407_v31 }
 0x196   : > { %v727_v32 = vpop.eup %726  ;;  %v433_v52 = vpop.permute.xlu1 %432 }
 0x197   : > { %v410_v33 = vsel %vm342_vm0, %v727_v32, 0.0  ;;  %v413_v34 = vpack.c.bf16 %v727_v32, %v725_v29  ;;  %v436_v54 = vmul.f32 %v433_v52, %v424_v51 }
 0x198   : > { %411 = vadd.xlane.f32.xlu2 %v410_v33 }
 0x199   : > { %670 = vmatmul.msk.bf16.vlgmr.msra.gmra.mxu1 %vm342_vm0, %v413_v34 }
 0x203   : > { %v409_v37 = vpop.xlane.xlu2 %408 }
 0x204   : > { %v418_v38 = vadd.f32 %v416_v36, %v409_v37 }
 0x206   : > { %421 = vst.msk [vmem:[#allocation3] sm:$0xff] %vm337_vm1, %v418_v38 }
 0x20b   : > { %v412_v41 = vpop.xlane.xlu2 %411 }
 0x20c   : > { %v419_v42 = vadd.f32 %v417_v40, %v412_v41 }
 0x20d   : > { %v467_v43 = vld [vmem:[#allocation3] sm:$0xff] }
 0x20e   : > { %422 = vst.msk [vmem:[#allocation3 + $0x8] sm:$0xff] %vm337_vm1, %v419_v42  ;;  %728 = vrcp.f32 %v467_v43 }
 0x214   : > { %v729_v46 = vpop.eup %728 }
 0x215   : > { %475 = vperm.xlu2 %719, %v729_v46   ;;  %v468_v48 = vld [vmem:[#allocation3 + $0x8] sm:$0xff] }
 0x216   : > { %v453_v49 = vpop.f32.mrf.mxu1  ;;  %730 = vrcp.f32 %v468_v48 }
 0x217   : > { %v458_v50 = vadd.f32 %v453_v49, %v435_v47 }
 0x219   : > { %460 = vst.msk [vmem:[#allocation4] sm:$0xff] %vm342_vm0, %v458_v50 }
 0x21c   : > { %v731_v53 = vpop.eup %730 }
 0x21d   : > { %480 = vperm.xlu1 %717, %v731_v53  }
 0x21e   : > { %v455_v55 = vpop.f32.mrf.mxu1 }
 0x21f   : > { %v459_v56 = vadd.f32 %v455_v55, %v436_v54 }
 0x220   : > { %v471_v58 = vld [vmem:[#allocation4] sm:$0xff] }
 0x221   : > { %461 = vst.msk [vmem:[#allocation4 + $0x8] sm:$0xff] %vm342_vm0, %v459_v56 }
 0x228   : > { %v472_v61 = vld [vmem:[#allocation4 + $0x8] sm:$0xff] }
 0x26f   : > { %v476_v57 = vpop.permute.xlu2 %475 }
 0x270   : > { %v483_v59 = vmul.f32 %v476_v57, %v471_v58 }
 0x272   : > { %v485_v60 = vpack.c.bf16 %v483_v59, %v483_v59 }
 0x274   : > { %488 = vst.msk [vmem:[%s330_s10] sm:$0xf] %vm487_vm3, %v485_v60 }
 0x28f   : > { %v481_v62 = vpop.permute.xlu1 %480 }
 0x290   : > { %v484_v63 = vmul.f32 %v481_v62, %v472_v61 }
 0x292   : > { %v486_v0 = vpack.c.bf16 %v484_v63, %v484_v63 }
 0x294   : > { %489 = vst.msk [vmem:[%s330_s10 + $0x4] sm:$0xf] %vm487_vm3, %v486_v0 }
 0x295 PF: > { %s13_s16 = sadd.s32 1, %s770_s16   ;;  %s889_s12 = smov %s762_s14 }
 0x296   : > { %p10_p7 = scmp.ge.s32.totalorder %s13_s16, 6   ;;  %s890_s13 = smov %s766_s15 }
 0x297   : > { %s891_s14 = smov %s894_s17  ;;  %s892_s15 = smov %s898_s18 }
 0x298   :  { %12 = sbr.rel (!%p10_p7) target bundleno = 3 (0x3), region = 76 }

</bundles_post_ra>
